<compile_context>
chip_gen: v7x
topology: tpu7x:2x2x1
jax: 0.10.0
libtpu: 0.0.40
codegen_flags: <defaults>
</compile_context>

<pallas_src>
import functools
import math

import jax
import jax.numpy as jnp
from jax.experimental import pallas as pl
from jax.experimental.pallas import tpu as pltpu


def imap_kernel(x_ref, wbar_ref, ssig_ref, invm_ref, cbias_ref,
                out_ref, logdet_ref, *, C, P):
    # x_ref:      (TB, C*P) VMEM  batch tile, channels flattened onto lanes
    # wbar_ref:   (1, C*P)  VMEM  mean-over-out-chan conv weight * checkerboard
    # ssig_ref:   (1, C*P)  VMEM  (sigmoid(s)+1e-5) * checkerboard
    # invm_ref:   (1, C*P)  VMEM  1 - checkerboard
    # cbias_ref:  (1, 1)    SMEM  mean(bias) + offset (folded scalar)
    # out_ref:    (TB, C*P) VMEM
    # logdet_ref: (TB, 1)   VMEM  per-batch (C//2) * sum_p log(attn)
    x = x_ref[...]                                   # (TB, C*P)

    # pool[b, p] = sum_c wbar[c] * mask[c, p] * x[b, c, p]  (+ folded bias).
    # The mask is folded into wbar in the wrapper; the channel reduction is
    # C lane-aligned slice adds (P is a multiple of 128 at these shapes).
    xwm = x * wbar_ref[...]                          # (TB, C*P)
    pool = xwm[:, 0:P]
    for c in range(1, C):
        pool = pool + xwm[:, c * P:(c + 1) * P]      # whole-vreg VALU adds

    attn = jax.nn.sigmoid(pool + cbias_ref[0, 0]) + 1e-5      # (TB, P)

    # attn_mask = mask * s_sig + (1 - mask) * attn   (single FMA, lane-dense)
    attn_full = jnp.concatenate([attn] * C, axis=1)            # (TB, C*P)
    out_ref[...] = x * (ssig_ref[...] + invm_ref[...] * attn_full)

    # Per-batch logdet contribution; batch-invariant term is in the wrapper.
    logdet_ref[...] = (C // 2) * jnp.sum(jnp.log(attn), axis=1, keepdims=True)


def _vmem_config():
    """(per-block byte budget, vmem_limit_bytes) sized per TPU generation."""
    cap = 64 << 20
    try:
        info = pltpu.get_tpu_info()
        cap = int(getattr(info, "vmem_capacity_bytes", cap))
    except Exception:
        pass
    if cap >= (128 << 20):            # v5e / v6e: 128 MiB VMEM
        return 16 << 20, 96 << 20
    return 6 << 20, 48 << 20          # v7x: 64 MiB per TensorCore


def _choose_tb(B, row_bytes, block_budget):
    """Largest divisor of B that fits the budget; >=4 grid steps when big."""
    total = B * row_bytes
    if total <= (1 << 20):            # whole problem is tiny: one block
        return B
    fit = max(1, block_budget // row_bytes)
    cap = max(1, min(fit, B // 4))    # aim for at least 4 grid steps
    cands = [d for d in range(1, B + 1) if B % d == 0 and d <= cap]
    if not cands:
        return 1
    mult8 = [d for d in cands if d % 8 == 0]
    return max(mult8) if mult8 else max(cands)


def imap_forward(x, weight, bias, s, offset, logdet=0.0):
    """Pallas implementation of IMAP.forward(reverse=False)."""
    B, C, H, W = x.shape
    assert C % 2 == 0, "checkerboard construction requires an even channel count"
    P = H * W
    CP = C * P

    x2d = x.reshape(B, CP).astype(jnp.float32)       # free row-major reshape

    # --- algebraic hoist of the conv + avg-pool ------------------------------
    w2d = weight.reshape(C, C).astype(jnp.float32)   # [out, in]
    w_bar = jnp.mean(w2d, axis=0)                    # (C,) mean over out-chans
    b_bar = jnp.mean(bias.astype(jnp.float32))
    off = jnp.asarray(offset, jnp.float32).reshape(-1)[0]
    pool_bias = jnp.reshape(b_bar + off, (1, 1))     # single SMEM scalar

    s_sig = jax.nn.sigmoid(s.reshape(C).astype(jnp.float32)) + 1e-5   # (C,)

    # --- checkerboard-derived lane-major constants, built once ---------------
    c_idx = jnp.arange(C, dtype=jnp.int32)[:, None]
    p_idx = jnp.arange(P, dtype=jnp.int32)[None, :]
    mask2d = ((c_idx + p_idx) % 2).astype(jnp.float32)                # (C, P)

    wbar_masked = (w_bar[:, None] * mask2d).reshape(1, CP)            # (1, CP)
    s_sig_masked = (s_sig[:, None] * mask2d).reshape(1, CP)           # (1, CP)
    inv_mask = (1.0 - mask2d).reshape(1, CP)                          # (1, CP)

    # --- batch tiling (TB divides B: no padding, no output re-slice) ---------
    block_budget, vmem_limit = _vmem_config()
    row_bytes = CP * 4
    TB = _choose_tb(B, row_bytes, block_budget)
    num_blocks = B // TB

    out2d, logdet_pb = pl.pallas_call(
        functools.partial(imap_kernel, C=C, P=P),
        out_shape=(
            jax.ShapeDtypeStruct((B, CP), jnp.float32),
            jax.ShapeDtypeStruct((B, 1), jnp.float32),
        ),
        grid_spec=pltpu.PrefetchScalarGridSpec(
            num_scalar_prefetch=0,
            grid=(num_blocks,),
            in_specs=[
                pl.BlockSpec((TB, CP), lambda i: (i, 0)),
                pl.BlockSpec((1, CP), lambda i: (0, 0)),
                pl.BlockSpec((1, CP), lambda i: (0, 0)),
                pl.BlockSpec((1, CP), lambda i: (0, 0)),
                pl.BlockSpec((1, 1), lambda i: (0, 0),
                             memory_space=pltpu.MemorySpace.SMEM),
            ],
            out_specs=(
                pl.BlockSpec((TB, CP), lambda i: (i, 0)),
                pl.BlockSpec((TB, 1), lambda i: (i, 0)),
            ),
        ),
        compiler_params=pltpu.CompilerParams(
            dimension_semantics=("parallel",),   # batches are independent
            vmem_limit_bytes=vmem_limit,
        ),
    )(x2d, wbar_masked, s_sig_masked, inv_mask, pool_bias)

    # Batch-invariant logdet term (torch sums log(sigmoid(s)+1e-5)*mask over
    # the full (B, C, P) mask == B * sum over the (C, P) checkerboard).
    batch_inv = B * jnp.sum(jnp.log(s_sig)[:, None] * mask2d)

    out = out2d.reshape(B, C, H, W)
    logdet_out = logdet + logdet_pb[:, 0] + batch_inv
    return out, logdet_out


def imap_reference(x, weight, bias, s, offset, logdet=0.0):
    """Pure-JAX reference mirroring the PyTorch forward (float32)."""
    B, C, H, W = x.shape
    P = H * W
    c_idx = jnp.arange(C)[:, None]
    p_idx = jnp.arange(P)[None, :]
    mask = ((c_idx + p_idx) % 2).astype(jnp.float32)          # (C, P)
    xf = x.reshape(B, C, P).astype(jnp.float32)
    xm = xf * mask
    w2 = weight.reshape(C, C)
    z = jnp.einsum("oi,bip->bop", w2, xm) + bias[None, :, None]
    pool = jnp.mean(z, axis=1)                                 # (B, P)
    attn = jax.nn.sigmoid(pool + offset[0]) + 1e-5             # (B, P)
    s_sig = jax.nn.sigmoid(s.reshape(1, C, 1)) + 1e-5
    attn_mask = (1.0 - mask)[None] * attn[:, None, :] + mask[None] * s_sig
    out = xf * attn_mask
    ld = logdet + (C // 2) * jnp.sum(jnp.log(attn), axis=-1)
    ld = ld + jnp.sum(jnp.log(s_sig) * jnp.broadcast_to(mask[None], (B, C, P)))
    return out.reshape(B, C, H, W), ld


if __name__ == "__main__":
    B, C, H, W = 2, 4, 16, 16

    key = jax.random.PRNGKey(0)
    k_x, k_w, k_b, k_s = jax.random.split(key, 4)

    # Deterministic parameter init matching the module's __init__ shapes/dists.
    fan_in = C * 1                                   # conv weight (C, C, 1)
    kaiming_bound = math.sqrt(6.0 / ((1.0 + 5.0) * fan_in))   # a = sqrt(5)
    weight = jax.random.uniform(k_w, (C, C, 1), jnp.float32,
                                -kaiming_bound, kaiming_bound)
    bias_bound = 1.0 / math.sqrt(fan_in)
    bias = jax.random.uniform(k_b, (C,), jnp.float32, -bias_bound, bias_bound)
    s = jax.random.normal(k_s, (1, C, 1), jnp.float32)
    offset = jnp.ones((1,), jnp.float32) * 8.0

    x = jax.random.normal(k_x, (B, C, H, W), jnp.float32)

    out, logdet = imap_forward(x, weight, bias, s, offset, logdet=0.0)
    out = jax.block_until_ready(out)
    logdet = jax.block_until_ready(logdet)

    out_ref, logdet_ref = imap_reference(x, weight, bias, s, offset, logdet=0.0)
    assert out.shape == (B, C, H, W) and logdet.shape == (B,)
    assert jnp.allclose(out, out_ref, rtol=1e-4, atol=1e-4)
    assert jnp.allclose(logdet, logdet_ref, rtol=1e-4, atol=1e-4)

    print("KERNEL_OK")
</pallas_src>

<mosaic_0001>
module attributes {stable_mosaic.version = 11 : i64} {
  func.func @imap_kernel(%arg0: i32, %arg1: memref<2x1024xf32, #tpu.memory_space<vmem>>, %arg2: memref<1x1024xf32, #tpu.memory_space<vmem>>, %arg3: memref<1x1024xf32, #tpu.memory_space<vmem>>, %arg4: memref<1x1024xf32, #tpu.memory_space<vmem>>, %arg5: memref<1x1xf32, #tpu.memory_space<smem>>, %arg6: memref<2x1024xf32, #tpu.memory_space<vmem>>, %arg7: memref<2x1xf32, #tpu.memory_space<vmem>>) attributes {dimension_semantics = [#tpu.dimension_semantics<parallel>], iteration_bounds = array<i64: 1>, scalar_prefetch = 0 : i64, scratch_operands = 0 : i64, tpu.core_type = #tpu.core_type<tc>, window_params = [{transform_indices = @transform_0, window_bounds = array<i64: 2, 1024>}, {pipeline_mode = #tpu.pipeline_mode<synchronous>, transform_indices = @transform_1, window_bounds = array<i64: 1, 1024>}, {pipeline_mode = #tpu.pipeline_mode<synchronous>, transform_indices = @transform_2, window_bounds = array<i64: 1, 1024>}, {pipeline_mode = #tpu.pipeline_mode<synchronous>, transform_indices = @transform_3, window_bounds = array<i64: 1, 1024>}, {transform_indices = @transform_4, window_bounds = array<i64: 1, 1>}, {transform_indices = @transform_5, window_bounds = array<i64: 2, 1024>}, {transform_indices = @transform_6, window_bounds = array<i64: 2, 1>}]} {
    %c0 = arith.constant 0 : index
    %c0_0 = arith.constant 0 : index
    %0 = vector.load %arg1[%c0, %c0_0] : memref<2x1024xf32, #tpu.memory_space<vmem>>, vector<2x1024xf32>
    %c0_1 = arith.constant 0 : index
    %c0_2 = arith.constant 0 : index
    %1 = vector.load %arg2[%c0_1, %c0_2] : memref<1x1024xf32, #tpu.memory_space<vmem>>, vector<1x1024xf32>
    %2 = vector.broadcast %1 : vector<1x1024xf32> to vector<2x1024xf32>
    %3 = arith.mulf %0, %2 : vector<2x1024xf32>
    %4 = vector.extract_strided_slice %3 {offsets = [0, 0], sizes = [2, 256], strides = [1, 1]} : vector<2x1024xf32> to vector<2x256xf32>
    %5 = vector.extract_strided_slice %3 {offsets = [0, 256], sizes = [2, 256], strides = [1, 1]} : vector<2x1024xf32> to vector<2x256xf32>
    %6 = arith.addf %4, %5 : vector<2x256xf32>
    %7 = vector.extract_strided_slice %3 {offsets = [0, 512], sizes = [2, 256], strides = [1, 1]} : vector<2x1024xf32> to vector<2x256xf32>
    %8 = arith.addf %6, %7 : vector<2x256xf32>
    %9 = vector.extract_strided_slice %3 {offsets = [0, 768], sizes = [2, 256], strides = [1, 1]} : vector<2x1024xf32> to vector<2x256xf32>
    %10 = arith.addf %8, %9 : vector<2x256xf32>
    %c0_3 = arith.constant 0 : index
    %c0_4 = arith.constant 0 : index
    %11 = memref.load %arg5[%c0_3, %c0_4] : memref<1x1xf32, #tpu.memory_space<smem>>
    %12 = vector.broadcast %11 : f32 to vector<2x256xf32>
    %13 = arith.addf %10, %12 : vector<2x256xf32>
    %14 = arith.negf %13 : vector<2x256xf32>
    %15 = math.exp %14 : vector<2x256xf32>
    %cst = arith.constant 1.000000e+00 : f32
    %16 = vector.broadcast %cst : f32 to vector<2x256xf32>
    %17 = arith.addf %16, %15 : vector<2x256xf32>
    %18 = arith.divf %16, %17 : vector<2x256xf32>
    %cst_5 = arith.constant 9.99999974E-6 : f32
    %19 = vector.broadcast %cst_5 : f32 to vector<2x256xf32>
    %20 = arith.addf %18, %19 : vector<2x256xf32>
    %21 = tpu.concatenate %20, %20, %20, %20 in 1 : vector<2x256xf32>, vector<2x256xf32>, vector<2x256xf32>, vector<2x256xf32> -> vector<2x1024xf32>
    %c0_6 = arith.constant 0 : index
    %c0_7 = arith.constant 0 : index
    %22 = vector.load %arg3[%c0_6, %c0_7] : memref<1x1024xf32, #tpu.memory_space<vmem>>, vector<1x1024xf32>
    %c0_8 = arith.constant 0 : index
    %c0_9 = arith.constant 0 : index
    %23 = vector.load %arg4[%c0_8, %c0_9] : memref<1x1024xf32, #tpu.memory_space<vmem>>, vector<1x1024xf32>
    %24 = vector.broadcast %23 : vector<1x1024xf32> to vector<2x1024xf32>
    %25 = arith.mulf %24, %21 : vector<2x1024xf32>
    %26 = vector.broadcast %22 : vector<1x1024xf32> to vector<2x1024xf32>
    %27 = arith.addf %26, %25 : vector<2x1024xf32>
    %28 = arith.mulf %0, %27 : vector<2x1024xf32>
    %c0_10 = arith.constant 0 : index
    %c0_11 = arith.constant 0 : index
    %29 = vector.load %arg6[%c0_10, %c0_11] : memref<2x1024xf32, #tpu.memory_space<vmem>>, vector<2x1024xf32>
    tpu.vector_store %arg6[%c0_10, %c0_11], %28 {strides = array<i32>} : memref<2x1024xf32, #tpu.memory_space<vmem>>, vector<2x1024xf32>,
    %30 = math.log %20 : vector<2x256xf32>
    %cst_12 = arith.constant dense<0.000000e+00> : vector<2xf32>
    %31 = vector.multi_reduction <add>, %30, %cst_12 [1] : vector<2x256xf32> to vector<2xf32>
    %32 = vector.shape_cast %31 : vector<2xf32> to vector<2x1xf32>
    %cst_13 = arith.constant 2.000000e+00 : f32
    %33 = vector.broadcast %cst_13 : f32 to vector<2x1xf32>
    %34 = arith.mulf %33, %32 : vector<2x1xf32>
    %c0_14 = arith.constant 0 : index
    %c0_15 = arith.constant 0 : index
    %35 = vector.load %arg7[%c0_14, %c0_15] : memref<2x1xf32, #tpu.memory_space<vmem>>, vector<2x1xf32>
    tpu.vector_store %arg7[%c0_14, %c0_15], %34 {strides = array<i32>} : memref<2x1xf32, #tpu.memory_space<vmem>>, vector<2x1xf32>,
    return
  }
  func.func @transform_0(%arg0: i32) -> (i32, i32) {
    %c0_i32 = arith.constant 0 : i32
    %c0_i32_0 = arith.constant 0 : i32
    return %arg0, %c0_i32 : i32, i32
  }
  func.func @transform_1(%arg0: i32) -> (i32, i32) {
    %c0_i32 = arith.constant 0 : i32
    %c0_i32_0 = arith.constant 0 : i32
    %c0_i32_1 = arith.constant 0 : i32
    return %c0_i32, %c0_i32_0 : i32, i32
  }
  func.func @transform_2(%arg0: i32) -> (i32, i32) {
    %c0_i32 = arith.constant 0 : i32
    %c0_i32_0 = arith.constant 0 : i32
    %c0_i32_1 = arith.constant 0 : i32
    return %c0_i32, %c0_i32_0 : i32, i32
  }
  func.func @transform_3(%arg0: i32) -> (i32, i32) {
    %c0_i32 = arith.constant 0 : i32
    %c0_i32_0 = arith.constant 0 : i32
    %c0_i32_1 = arith.constant 0 : i32
    return %c0_i32, %c0_i32_0 : i32, i32
  }
  func.func @transform_4(%arg0: i32) -> (i32, i32) {
    %c0_i32 = arith.constant 0 : i32
    %c0_i32_0 = arith.constant 0 : i32
    %c0_i32_1 = arith.constant 0 : i32
    return %c0_i32, %c0_i32_0 : i32, i32
  }
  func.func @transform_5(%arg0: i32) -> (i32, i32) {
    %c0_i32 = arith.constant 0 : i32
    %c0_i32_0 = arith.constant 0 : i32
    return %arg0, %c0_i32 : i32, i32
  }
  func.func @transform_6(%arg0: i32) -> (i32, i32) {
    %c0_i32 = arith.constant 0 : i32
    %c0_i32_0 = arith.constant 0 : i32
    return %arg0, %c0_i32 : i32, i32
  }
}

</mosaic_0001>

<bundles_post_ra>
// kernel: tpu_custom_call.1
= control target key start
LH: loop header
LB: loop body
LE: loop exit
PB: predicated region body
PF: predicated region fallthrough
CT: control target
= control target key end

     0   :  { %13 = vsyncpa [#allocation4], 0  ;;  %s616_s0 = inlined_call_operand.hbm [shape: f32[2,1024], index: 0, kind: input, shape index: {}]   ;;  %s617_s1 = inlined_call_operand.hbm [shape: f32[1,1024], index: 1, kind: input, shape index: {}]   ;;  %s618_s2 = inlined_call_operand.vmem [shape: f32[1,1024], index: 2, kind: input, shape index: {}]   ;;  %s619_s3 = inlined_call_operand.hbm [shape: f32[1,1024], index: 3, kind: input, shape index: {}]   ;;  %s620_s4 = inlined_call_operand.<no memory space> [shape: f32[1,1], index: 4, kind: input, shape index: {}]   ;;  %s621_s5 = inlined_call_operand.hbm [shape: f32[2,1024], index: 5, kind: output, shape index: {0}]   ;;  %s622_s6 = inlined_call_operand.vmem [shape: f32[2,1], index: 6, kind: output, shape index: {1}]  }
   0x1   :  { %14 = vsyncpa [#allocation7], 0 }
   0x2   :  { %15 = vsyncpa [#allocation5], 0  ;;  %s459_s21 = smov [#allocation6]   ;;  %s460_s23 = smov [#allocation3]  }
   0x3   :  { %s32_s22 = sshll.u32 %s459_s21, 4  ;;  %s22_s24 = sshll.u32 %s460_s23, 4  ;;  %s33_s22 = int_to_ptr.vmem [resolvable:$true] %s32_s22  ;;  %s23_s24 = int_to_ptr.vmem [resolvable:$true] %s22_s24 }
   0x4   :  { %s365_s27 = scalar_lea.hbm %s617_s1, 128 }
   0x5   :  { %p366_p0 = scmp.ne.s32.totalorder %s617_s1, %s365_s27  ;;  %p369_p1 = scmp.lt.u32.totalorder %s365_s27, %s617_s1 }
   0x7   :  { %p371_p2 = pnand %p369_p1, %p366_p0 }
   0x9   :  { %374 = shalt.err (!%p371_p2)
}
   0xa   :  { %s375_s8 = scalar_lea.vmem %s33_s22, 128  ;;  %p380_p4 = scmp.lt.s32.totalorder %s33_s22, %s33_s22 }
   0xb   :  { %p376_p3 = scmp.ne.s32.totalorder %s33_s22, %s375_s8  ;;  %p381_p5 = scmp.lt.s32.totalorder %s375_s8, %s375_s8 }
   0xd   :  { %p382_p6 = por %p381_p5, %p380_p4 }
   0xf   :  { %p383_p7 = pnand %p382_p6, %p376_p3 }
  0x11   :  { %386 = shalt.err (!%p383_p7)
}
  0x12   :  { %35 = dma.hbm_to_vmem [thread:$0]  %s617_s1, 128, %s33_s22, [#allocation7]  }
  0x13   :  { %s387_s13 = scalar_lea.hbm %s616_s0, 256 }
  0x14   :  { %p388_p8 = scmp.ne.s32.totalorder %s616_s0, %s387_s13  ;;  %p391_p9 = scmp.lt.u32.totalorder %s387_s13, %s616_s0 }
  0x16   :  { %p393_p10 = pnand %p391_p9, %p388_p8 }
  0x18   :  { %396 = shalt.err (!%p393_p10)
}
  0x19   :  { %s397_s18 = scalar_lea.vmem %s23_s24, 256  ;;  %p402_p12 = scmp.lt.s32.totalorder %s23_s24, %s23_s24 }
  0x1a   :  { %p398_p11 = scmp.ne.s32.totalorder %s23_s24, %s397_s18  ;;  %p403_p13 = scmp.lt.s32.totalorder %s397_s18, %s397_s18 }
  0x1c   :  { %p404_p0 = por %p403_p13, %p402_p12 }
  0x1e   :  { %p405_p1 = pnand %p404_p0, %p398_p11 }
  0x20   :  { %408 = shalt.err (!%p405_p1)
}
  0x21   :  { %25 = dma.hbm_to_vmem [thread:$0]  %s616_s0, 256, %s23_s24, [#allocation4]  }
  0x22   :  { %s461_s20 = smov [#allocation8]   ;;  %s409_s25 = scalar_lea.hbm %s619_s3, 128 }
  0x23   :  { %s44_s21 = sshll.u32 %s461_s20, 4  ;;  %p410_p2 = scmp.ne.s32.totalorder %s619_s3, %s409_s25  ;;  %s45_s21 = int_to_ptr.vmem [resolvable:$true] %s44_s21 }
  0x24   :  { %p413_p3 = scmp.lt.u32.totalorder %s409_s25, %s619_s3 }
  0x26   :  { %p415_p4 = pnand %p413_p3, %p410_p2 }
  0x28   :  { %418 = shalt.err (!%p415_p4)
}
  0x29   :  { %s419_s30 = scalar_lea.vmem %s45_s21, 128  ;;  %p424_p6 = scmp.lt.s32.totalorder %s45_s21, %s45_s21 }
  0x2a   :  { %p420_p5 = scmp.ne.s32.totalorder %s45_s21, %s419_s30  ;;  %p425_p7 = scmp.lt.s32.totalorder %s419_s30, %s419_s30 }
  0x2c   :  { %p426_p8 = por %p425_p7, %p424_p6 }
  0x2e   :  { %p427_p9 = pnand %p426_p8, %p420_p5 }
  0x30   :  { %430 = shalt.err (!%p427_p9)
}
  0x31   :  { %47 = dma.hbm_to_vmem [thread:$0]  %s619_s3, 128, %s45_s21, [#allocation7]  }
  0x32   :  { %453 = dma.done.wait [#allocation4], 256  }
  0x33   :  { %454 = vsyncadd [#allocation4], 4294967040 }
  0x34   :  { %455 = dma.done.wait [#allocation7], 256  }
  0x35   :  { %456 = vsyncadd [#allocation7], 4294967040  ;;  %v63_v0 = vlaneseq  ;;  %v462_v1 = vmov 1983009808   ;;  %v61_v13 = vld [vmem:[#allocation6] sm:$0xff]  ;;  %v563_v29 = vld [vmem:[#allocation3] sm:$0xff]  ;;  %v143_v41 = vstv %s620_s4 }
  0x36   :  { %v98_v2 = vunpack.c.l.s4 %v462_v1  ;;  %v567_v32 = vld [vmem:[#allocation3 + $0x8] sm:$0xff]  ;;  %vm324_vm0 = vcmask 1041408   ;;  %v164_v57 = vld [vmem:[#allocation8] sm:$0xff]  ;;  %v163_v62 = vld [vmem:[%s618_s2] sm:$0xff]  ;;  %s463_s2 = smov [#allocation9]  }
  0x37   :  { %v64_v3 = vshrl.u32 %v63_v0, 7  ;;  %s339_s9 = sshll.u32 %s463_s2, 4  ;;  %s340_s9 = int_to_ptr.vmem [resolvable:$true] %s339_s9 }
  0x38   :  { %v99_v4 = vunpack.c.0.s8 %v98_v2  ;;  %s431_s10 = scalar_lea.vmem %s340_s9, 256  ;;  %p436_p11 = scmp.lt.s32.totalorder %s340_s9, %s340_s9 }
  0x39   :  { %v535_v5 = vsub.s32 0, %v64_v3  ;;  %v537_v6 = vsub.s32 1, %v64_v3  ;;  %v539_v7 = vsub.s32 2, %v64_v3  ;;  %v541_v8 = vsub.s32 3, %v64_v3  ;;  %p432_p10 = scmp.ne.s32.totalorder %s340_s9, %s431_s10  ;;  %p437_p12 = scmp.lt.s32.totalorder %s431_s10, %s431_s10 }
  0x3a   :  { %v543_v9 = vsub.s32 4, %v64_v3  ;;  %v545_v10 = vsub.s32 5, %v64_v3  ;;  %v547_v11 = vsub.s32 6, %v64_v3  ;;  %v549_v12 = vsub.s32 7, %v64_v3 }
  0x3b   :  { %v551_v14 = vsub.s32 %v99_v4, %v64_v3  ;;  %v66_v15 = vrot.slane %v61_v13, %v535_v5  ;;  %v70_v16 = vrot.slane %v61_v13, %v537_v6  ;;  %v74_v17 = vrot.slane %v61_v13, %v539_v7  ;;  %p438_p13 = por %p437_p12, %p436_p11 }
  0x3c   :  { %v78_v18 = vrot.slane %v61_v13, %v541_v8  ;;  %v82_v19 = vrot.slane %v61_v13, %v543_v9  ;;  %v86_v20 = vrot.slane %v61_v13, %v545_v10  ;;  %v90_v21 = vrot.slane %v61_v13, %v547_v11 }
  0x3d   :  { %v94_v22 = vrot.slane %v61_v13, %v549_v12  ;;  %v95_v23 = vcombine.low %v66_v15, %v70_v16  ;;  %v169_v59 = vrot.slane %v164_v57, %v535_v5  ;;  %v173_v60 = vrot.slane %v164_v57, %v537_v6  ;;  %p439_p0 = pnand %p438_p13, %p432_p10 }
  0x3e   :  { %v96_v24 = vcombine.low %v74_v17, %v78_v18  ;;  %v112_v25 = vcombine.low %v82_v19, %v86_v20  ;;  %v177_v61 = vrot.slane %v164_v57, %v539_v7  ;;  %v181_v63 = vrot.slane %v164_v57, %v541_v8 }
  0x3f   :  { %v113_v26 = vcombine.low %v90_v21, %v94_v22  ;;  %v103_v27 = vrot.slane %v95_v23, %v551_v14  ;;  %v185_v0 = vrot.slane %v164_v57, %v543_v9  ;;  %v189_v1 = vrot.slane %v164_v57, %v545_v10 }
  0x40   :  { %v110_v28 = vrot.slane %v96_v24, %v551_v14  ;;  %v120_v30 = vrot.slane %v112_v25, %v551_v14  ;;  %v193_v2 = vrot.slane %v164_v57, %v547_v11  ;;  %v197_v3 = vrot.slane %v164_v57, %v549_v12 }
  0x41   :  { %v127_v31 = vrot.slane %v113_v26, %v551_v14  ;;  %v218_v21 = vrot.slane %v163_v62, %v535_v5  ;;  %v222_v22 = vrot.slane %v163_v62, %v537_v6  ;;  %v226_v23 = vrot.slane %v163_v62, %v539_v7 }
  0x42   :  { %v111_v33 = vcombine.low %v103_v27, %v110_v28  ;;  %v230_v24 = vrot.slane %v163_v62, %v541_v8  ;;  %v234_v25 = vrot.slane %v163_v62, %v543_v9  ;;  %v238_v26 = vrot.slane %v163_v62, %v545_v10 }
  0x43   :  { %v128_v34 = vcombine.low %v120_v30, %v127_v31  ;;  %v242_v27 = vrot.slane %v163_v62, %v547_v11  ;;  %v246_v28 = vrot.slane %v163_v62, %v549_v12 }
  0x44   :  { %v131_v35 = vmul.f32 %v111_v33, %v563_v29 }
  0x45   :  { %v132_v36 = vmul.f32 %v128_v34, %v567_v32 }
  0x46   :  { %v134_v37 = vrot.slane %v131_v35, 4 }
  0x47   :  { %v139_v39 = vrot.slane %v132_v36, 4 }
  0x48   :  { %v136_v38 = vadd.f32 %v134_v37, %v131_v35 }
  0x4a   :  { %v137_v40 = vadd.f32 %v136_v38, %v132_v36 }
  0x4c   :  { %v141_v42 = vadd.f32 %v139_v39, %v137_v40 }
  0x4e   :  { %v144_v43 = vadd.f32 %v143_v41, %v141_v42 }
  0x50   :  { %v353_v44 = vmul.f32 -1.442695, %v144_v43 }
  0x52   :  { %359 = vpow2.f32 %v353_v44 }
  0x5c   :  { %v360_v45 = vpop.eup %359 }
  0x5d   :  { %v148_v46 = vadd.f32 1.0, %v360_v45 }
  0x5f   :  { %361 = vrcp.f32 %v148_v46 }
  0x69   :  { %v362_v47 = vpop.eup %361 }
  0x6a   :  { %v151_v48 = vadd.f32 1e-05, %v362_v47 }
  0x6c   :  { %363 = vlog2.f32 %v151_v48  ;;  %v159_v54 = vrot.slane %v151_v48, %v551_v14 }
  0x6e   :  { %v160_v58 = vcombine.high %v159_v54, %v159_v54  ;;  %v206_v4 = vmul.f32 %v169_v59, %v159_v54  ;;  %v208_v15 = vmul.f32 %v177_v61, %v159_v54  ;;  %v210_v17 = vmul.f32 %v185_v0, %v159_v54 }
  0x6f   :  { %v212_v19 = vmul.f32 %v193_v2, %v159_v54 }
  0x70   :  { %v207_v13 = vmul.f32 %v173_v60, %v160_v58  ;;  %v209_v16 = vmul.f32 %v181_v63, %v160_v58  ;;  %v211_v18 = vmul.f32 %v189_v1, %v160_v58  ;;  %v213_v20 = vmul.f32 %v197_v3, %v160_v58 }
  0x71   :  { %v255_v30 = vadd.f32 %v218_v21, %v206_v4  ;;  %v257_v33 = vadd.f32 %v226_v23, %v208_v15  ;;  %v259_v35 = vadd.f32 %v234_v25, %v210_v17  ;;  %v261_v36 = vadd.f32 %v242_v27, %v212_v19 }
  0x72   :  { %v256_v31 = vadd.f32 %v222_v22, %v207_v13  ;;  %v258_v34 = vadd.f32 %v230_v24, %v209_v16  ;;  %v260_v5 = vadd.f32 %v238_v26, %v211_v18  ;;  %v262_v6 = vadd.f32 %v246_v28, %v213_v20 }
  0x74   :  { %v271_v37 = vcombine.low %v255_v30, %v256_v31  ;;  %v272_v7 = vcombine.low %v257_v33, %v258_v34  ;;  %v288_v38 = vcombine.low %v259_v35, %v260_v5  ;;  %v289_v9 = vcombine.low %v261_v36, %v262_v6 }
  0x76   :  { %v364_v49 = vpop.eup %363  ;;  %v279_v8 = vrot.slane %v271_v37, %v551_v14  ;;  %v286_v10 = vrot.slane %v272_v7, %v551_v14  ;;  %v296_v11 = vrot.slane %v288_v38, %v551_v14  ;;  %v303_v12 = vrot.slane %v289_v9, %v551_v14 }
  0x77   :  { %v312_v50 = vmul.f32 0.6931472, %v364_v49 }
  0x78   :  { %v287_v39 = vcombine.low %v279_v8, %v286_v10  ;;  %v304_v40 = vcombine.low %v296_v11, %v303_v12 }
  0x79   :  { %v320_v51 = vrot.slane %v312_v50, %v551_v14 }
  0x7a   :  { %v307_v41 = vmul.f32 %v287_v39, %v563_v29  ;;  %v308_v42 = vmul.f32 %v304_v40, %v567_v32 }
  0x7b   :  { %v321_v52 = vcombine.high %v320_v51, %v320_v51  ;;  %v325_v53 = vsel %vm324_vm0, %v320_v51, 0.0 }
  0x7c   :  { %309 = vst [vmem:[#allocation9] sm:$0xff] %v307_v41  ;;  %310 = vst [vmem:[#allocation9 + $0x8] sm:$0xff] %v308_v42 }
  0x7d   :  { %v326_v55 = vsel %vm324_vm0, %v321_v52, 0.0 }
  0x7e   :  { %v327_v56 = vadd.f32 %v326_v55, %v325_v53 }
  0x80   :  { %328 = vadd.xlane.f32.xlu0 %v327_v56 }
  0x81   :  { %442 = shalt.err (!%p439_p0)
}
  0x82   :  { %s443_s13 = scalar_lea.hbm %s621_s5, 256 }
  0x83   :  { %p444_p1 = scmp.ne.s32.totalorder %s621_s5, %s443_s13  ;;  %p447_p2 = scmp.lt.u32.totalorder %s443_s13, %s621_s5 }
  0x85   :  { %p449_p3 = pnand %p447_p2, %p444_p1 }
  0x87   :  { %452 = shalt.err (!%p449_p3)
}
  0x88   :  { %342 = dma.vmem_to_hbm [thread:$0]  %s340_s9, 256, %s621_s5, [#allocation5]   ;;  %vm331_vm1 = vcmask 1024  }
 0x10d   :  { %v329_v14 = vpop.xlane.xlu0 %328 }
 0x10e   :  { %v330_v29 = vmul.f32 2.0, %v329_v14 }
 0x110   :  { %332 = vst.msk [vmem:[%s622_s6] sm:$0x3] %vm331_vm1, %v330_v29 }
 0x111   :  { %457 = dma.done.wait [#allocation5], 256  }
 0x112   :  { %458 = vsyncadd [#allocation5], 4294967040 }
 0x113   :  { %350 = vsyncpa [#allocation4], 1 }
 0x114   :  { %351 = vsyncpa [#allocation7], 1 }
 0x115   :  { %352 = vsyncpa [#allocation5], 1 }

</bundles_post_ra>
